<compile_context>
chip_gen: v7x
topology: tpu7x:2x2x1
jax: 0.10.0
libtpu: 0.0.40
codegen_flags: <defaults>
</compile_context>

<pallas_src>
import functools

import numpy as np

import jax
import jax.numpy as jnp
from jax.experimental import pallas as pl
from jax.experimental.pallas import tpu as pltpu

_PI = np.float32(np.pi)
_TWO_PI = np.float32(2.0 * np.pi)
_INV_TWO_PI = np.float32(1.0 / (2.0 * np.pi))


def _custom_loss_kernel(q_ref, p1_ref, p2_ref, out_ref, acc_ref):
    inner = pl.program_id(1)

    @pl.when(inner == 0)
    def _init():
        acc_ref[...] = jnp.zeros_like(acc_ref)

    d = p1_ref[...] - p2_ref[...]          # (3, TB) f32, lane-dense
    dx = d[0:1, :]
    dy = d[1:2, :]
    dt = d[2:3, :]

    # Wrap theta to [-pi, pi):  x - 2*pi * floor((x + pi) * (1/(2*pi)))
    dt = dt - _TWO_PI * jnp.floor((dt + _PI) * _INV_TWO_PI)

    # Pre-combined symmetric coefficients from SMEM: [q00, q11, q22, q01+q10, q02+q20, q12+q21]
    c_xx = q_ref[0]
    c_yy = q_ref[1]
    c_tt = q_ref[2]
    c_xy = q_ref[3]
    c_xt = q_ref[4]
    c_yt = q_ref[5]

    quad = (c_xx * (dx * dx)
            + c_yy * (dy * dy)
            + c_tt * (dt * dt)
            + c_xy * (dx * dy)
            + c_xt * (dx * dt)
            + c_yt * (dy * dt))            # (1, TB)

    # Elementwise (VALU) accumulation only; no per-step cross-lane reduce.
    acc_ref[...] += quad

    @pl.when(inner == pl.num_programs(1) - 1)
    def _finalize():
        # One XLU reduce per core at the very end; per-core partial sum.
        out_ref[...] = jnp.sum(acc_ref[...]).reshape(1, 1, 1)


def _round_up(x, m):
    return ((x + m - 1) // m) * m


@functools.partial(jax.jit, static_argnames=("max_tb", "core_split"))
def custom_loss(p1, p2, Q, *, max_tb=8192, core_split=2):
    """Pallas implementation of CustomLoss.forward. Returns an f32 scalar."""
    assert p1.shape == p2.shape and p1.ndim == 2 and p1.shape[1] == 3
    assert Q.shape == (3, 3)
    B = p1.shape[0]

    # Collapse the core split for tiny batches (per-grid-step overhead dominates).
    split = core_split if B >= 256 else 1

    # Batch tiling: lane-dense tiles of width tb (multiple of 128), split across a
    # leading "parallel" axis for v7x's two TensorCores.
    per_core = -(-B // split)
    tb = min(max_tb, _round_up(max(per_core, 1), 128))
    n_inner = -(-per_core // tb)
    b_pad = split * n_inner * tb

    # Component-major, zero-padded layout: (3, B_pad). Padded columns give
    # delta = 0 -> wrapped theta = 0 -> zero contribution to the sum.
    p1t = jnp.zeros((3, b_pad), jnp.float32).at[:, :B].set(p1.astype(jnp.float32).T)
    p2t = jnp.zeros((3, b_pad), jnp.float32).at[:, :B].set(p2.astype(jnp.float32).T)

    Qf = Q.astype(jnp.float32)
    q6 = jnp.stack([Qf[0, 0], Qf[1, 1], Qf[2, 2],
                    Qf[0, 1] + Qf[1, 0],
                    Qf[0, 2] + Qf[2, 0],
                    Qf[1, 2] + Qf[2, 1]])

    partials = pl.pallas_call(
        _custom_loss_kernel,
        out_shape=jax.ShapeDtypeStruct((split, 1, 1), jnp.float32),
        grid=(split, n_inner),
        in_specs=[
            pl.BlockSpec(memory_space=pltpu.MemorySpace.SMEM),          # Q coeffs (SMEM scalars)
            pl.BlockSpec((3, tb), lambda c, i: (0, c * n_inner + i)),   # p1 tile
            pl.BlockSpec((3, tb), lambda c, i: (0, c * n_inner + i)),   # p2 tile
        ],
        out_specs=pl.BlockSpec((1, 1, 1), lambda c, i: (c, 0, 0)),
        scratch_shapes=[pltpu.VMEM((1, tb), jnp.float32)],              # lane-wide accumulator
        compiler_params=pltpu.CompilerParams(
            dimension_semantics=("parallel", "arbitrary")),
    )(q6, p1t, p2t)

    return jnp.sum(partials) / jnp.float32(B)


def _reference_loss(p1, p2, Q):
    """Pure-JAX reference matching the PyTorch module semantics."""
    delta = p1.astype(jnp.float32) - p2.astype(jnp.float32)
    theta = jnp.mod(delta[:, 2] + np.pi, 2.0 * np.pi) - np.pi
    delta = delta.at[:, 2].set(theta)
    quad = jnp.einsum("bi,ij,bj->b", delta, Q.astype(jnp.float32), delta)
    return jnp.mean(quad)


if __name__ == "__main__":
    key = jax.random.PRNGKey(0)
    k1, k2, k3, k4 = jax.random.split(key, 4)

    # Deterministic 3x3 positive-definite Q.
    A = jnp.array([[1.0, 0.2, 0.0],
                   [0.1, 0.8, 0.3],
                   [0.0, 0.4, 1.2]], dtype=jnp.float32)
    Q = A @ A.T + 0.5 * jnp.eye(3, dtype=jnp.float32)

    scale = jnp.array([1.0, 1.0, 4.0], jnp.float32)  # make theta deltas exceed [-pi, pi]

    # Small case matching the module spec: (batch_size, 3) poses.
    B = 8
    p1 = jax.random.normal(k1, (B, 3), jnp.float32) * scale
    p2 = jax.random.normal(k2, (B, 3), jnp.float32) * scale

    loss = jax.block_until_ready(custom_loss(p1, p2, Q))
    ref = jax.block_until_ready(_reference_loss(p1, p2, Q))
    assert jnp.allclose(loss, ref, rtol=1e-5, atol=1e-5), (loss, ref)

    # Larger, non-divisible case exercising multi-tile accumulation, padding and
    # the 2-way core split (small max_tb forces several inner reduction steps).
    B2 = 1000
    p1b = jax.random.normal(k3, (B2, 3), jnp.float32) * scale
    p2b = jax.random.normal(k4, (B2, 3), jnp.float32) * scale
    loss2 = jax.block_until_ready(custom_loss(p1b, p2b, Q, max_tb=128))
    ref2 = jax.block_until_ready(_reference_loss(p1b, p2b, Q))
    assert jnp.allclose(loss2, ref2, rtol=1e-4, atol=1e-5), (loss2, ref2)

    print("KERNEL_OK")
</pallas_src>

<mosaic_0001>
module attributes {stable_mosaic.version = 11 : i64} {
  func.func @_custom_loss_kernel(%arg0: i32, %arg1: i32, %arg2: memref<6xf32, #tpu.memory_space<smem>>, %arg3: memref<3x128xf32, #tpu.memory_space<vmem>>, %arg4: memref<3x128xf32, #tpu.memory_space<vmem>>, %arg5: memref<1x1x1xf32, #tpu.memory_space<vmem>>, %arg6: memref<1x128xf32, #tpu.memory_space<vmem>>) attributes {dimension_semantics = [#tpu.dimension_semantics<parallel>, #tpu.dimension_semantics<arbitrary>], iteration_bounds = array<i64: 1, 1>, scalar_prefetch = 0 : i64, scratch_operands = 1 : i64, tpu.core_type = #tpu.core_type<tc>, window_params = [{transform_indices = @transform_0, window_bounds = array<i64: 6>}, {transform_indices = @transform_1, window_bounds = array<i64: 3, 128>}, {transform_indices = @transform_2, window_bounds = array<i64: 3, 128>}, {transform_indices = @transform_3, window_bounds = array<i64: 1, 1, 1>}]} {
    %c0_i32 = arith.constant 0 : i32
    %0 = arith.cmpi eq, %arg1, %c0_i32 : i32
    %1 = arith.extui %0 : i1 to i32
    %c0_i32_0 = arith.constant 0 : i32
    %2 = arith.cmpi ne, %1, %c0_i32_0 : i32
    scf.if %2 {
      %cst_13 = arith.constant 0.000000e+00 : f32
      %52 = vector.broadcast %cst_13 : f32 to vector<1x128xf32>
      %c0_14 = arith.constant 0 : index
      %c0_15 = arith.constant 0 : index
      %53 = vector.load %arg6[%c0_14, %c0_15] : memref<1x128xf32, #tpu.memory_space<vmem>>, vector<1x128xf32>
      tpu.vector_store %arg6[%c0_14, %c0_15], %52 {strides = array<i32>} : memref<1x128xf32, #tpu.memory_space<vmem>>, vector<1x128xf32>,
    } else {
    }
    %c0 = arith.constant 0 : index
    %c0_1 = arith.constant 0 : index
    %3 = vector.load %arg3[%c0, %c0_1] : memref<3x128xf32, #tpu.memory_space<vmem>>, vector<3x128xf32>
    %c0_2 = arith.constant 0 : index
    %c0_3 = arith.constant 0 : index
    %4 = vector.load %arg4[%c0_2, %c0_3] : memref<3x128xf32, #tpu.memory_space<vmem>>, vector<3x128xf32>
    %5 = arith.subf %3, %4 : vector<3x128xf32>
    %6 = vector.extract_strided_slice %5 {offsets = [0, 0], sizes = [1, 128], strides = [1, 1]} : vector<3x128xf32> to vector<1x128xf32>
    %7 = vector.extract_strided_slice %5 {offsets = [1, 0], sizes = [1, 128], strides = [1, 1]} : vector<3x128xf32> to vector<1x128xf32>
    %8 = vector.extract_strided_slice %5 {offsets = [2, 0], sizes = [1, 128], strides = [1, 1]} : vector<3x128xf32> to vector<1x128xf32>
    %cst = arith.constant 3.14159274 : f32
    %9 = vector.broadcast %cst : f32 to vector<1x128xf32>
    %10 = arith.addf %8, %9 : vector<1x128xf32>
    %cst_4 = arith.constant 0.159154937 : f32
    %11 = vector.broadcast %cst_4 : f32 to vector<1x128xf32>
    %12 = arith.mulf %10, %11 : vector<1x128xf32>
    %13 = math.floor %12 : vector<1x128xf32>
    %cst_5 = arith.constant 6.28318548 : f32
    %14 = vector.broadcast %cst_5 : f32 to vector<1x128xf32>
    %15 = arith.mulf %14, %13 : vector<1x128xf32>
    %16 = arith.subf %8, %15 : vector<1x128xf32>
    %c0_6 = arith.constant 0 : index
    %17 = memref.load %arg2[%c0_6] : memref<6xf32, #tpu.memory_space<smem>>
    %c1 = arith.constant 1 : index
    %18 = memref.load %arg2[%c1] : memref<6xf32, #tpu.memory_space<smem>>
    %c2 = arith.constant 2 : index
    %19 = memref.load %arg2[%c2] : memref<6xf32, #tpu.memory_space<smem>>
    %c3 = arith.constant 3 : index
    %20 = memref.load %arg2[%c3] : memref<6xf32, #tpu.memory_space<smem>>
    %c4 = arith.constant 4 : index
    %21 = memref.load %arg2[%c4] : memref<6xf32, #tpu.memory_space<smem>>
    %c5 = arith.constant 5 : index
    %22 = memref.load %arg2[%c5] : memref<6xf32, #tpu.memory_space<smem>>
    %23 = arith.mulf %6, %6 : vector<1x128xf32>
    %24 = vector.broadcast %17 : f32 to vector<1x128xf32>
    %25 = arith.mulf %24, %23 : vector<1x128xf32>
    %26 = arith.mulf %7, %7 : vector<1x128xf32>
    %27 = vector.broadcast %18 : f32 to vector<1x128xf32>
    %28 = arith.mulf %27, %26 : vector<1x128xf32>
    %29 = arith.addf %25, %28 : vector<1x128xf32>
    %30 = arith.mulf %16, %16 : vector<1x128xf32>
    %31 = vector.broadcast %19 : f32 to vector<1x128xf32>
    %32 = arith.mulf %31, %30 : vector<1x128xf32>
    %33 = arith.addf %29, %32 : vector<1x128xf32>
    %34 = arith.mulf %6, %7 : vector<1x128xf32>
    %35 = vector.broadcast %20 : f32 to vector<1x128xf32>
    %36 = arith.mulf %35, %34 : vector<1x128xf32>
    %37 = arith.addf %33, %36 : vector<1x128xf32>
    %38 = arith.mulf %6, %16 : vector<1x128xf32>
    %39 = vector.broadcast %21 : f32 to vector<1x128xf32>
    %40 = arith.mulf %39, %38 : vector<1x128xf32>
    %41 = arith.addf %37, %40 : vector<1x128xf32>
    %42 = arith.mulf %7, %16 : vector<1x128xf32>
    %43 = vector.broadcast %22 : f32 to vector<1x128xf32>
    %44 = arith.mulf %43, %42 : vector<1x128xf32>
    %45 = arith.addf %41, %44 : vector<1x128xf32>
    %c0_7 = arith.constant 0 : index
    %c0_8 = arith.constant 0 : index
    %46 = vector.load %arg6[%c0_7, %c0_8] : memref<1x128xf32, #tpu.memory_space<vmem>>, vector<1x128xf32>
    %47 = arith.addf %46, %45 : vector<1x128xf32>
    %c0_9 = arith.constant 0 : index
    %c0_10 = arith.constant 0 : index
    %48 = vector.load %arg6[%c0_9, %c0_10] : memref<1x128xf32, #tpu.memory_space<vmem>>, vector<1x128xf32>
    tpu.vector_store %arg6[%c0_9, %c0_10], %47 {strides = array<i32>} : memref<1x128xf32, #tpu.memory_space<vmem>>, vector<1x128xf32>,
    %c0_i32_11 = arith.constant 0 : i32
    %49 = arith.cmpi eq, %arg1, %c0_i32_11 : i32
    %50 = arith.extui %49 : i1 to i32
    %c0_i32_12 = arith.constant 0 : i32
    %51 = arith.cmpi ne, %50, %c0_i32_12 : i32
    scf.if %51 {
      %c0_13 = arith.constant 0 : index
      %c0_14 = arith.constant 0 : index
      %52 = vector.load %arg6[%c0_13, %c0_14] : memref<1x128xf32, #tpu.memory_space<vmem>>, vector<1x128xf32>
      %53 = vector.shape_cast %52 : vector<1x128xf32> to vector<1x1x128xf32>
      %cst_15 = arith.constant dense<0.000000e+00> : vector<1xf32>
      %54 = vector.multi_reduction <add>, %53, %cst_15 [1, 2] : vector<1x1x128xf32> to vector<1xf32>
      %55 = vector.shape_cast %54 : vector<1xf32> to vector<1x1x1xf32>
      %56 = vector.extract %55[0, 0, 0] : f32 from vector<1x1x1xf32>
      %57 = vector.broadcast %56 : f32 to vector<1x1x1xf32>
      %c0_16 = arith.constant 0 : index
      %c0_17 = arith.constant 0 : index
      %c0_18 = arith.constant 0 : index
      %58 = vector.load %arg5[%c0_16, %c0_17, %c0_18] : memref<1x1x1xf32, #tpu.memory_space<vmem>>, vector<1x1x1xf32>
      tpu.vector_store %arg5[%c0_16, %c0_17, %c0_18], %57 {strides = array<i32>} : memref<1x1x1xf32, #tpu.memory_space<vmem>>, vector<1x1x1xf32>,
    } else {
    }
    return
  }
  func.func @transform_0(%arg0: i32, %arg1: i32) -> i32 {
    %c0_i32 = arith.constant 0 : i32
    %c0_i32_0 = arith.constant 0 : i32
    return %c0_i32 : i32
  }
  func.func @transform_1(%arg0: i32, %arg1: i32) -> (i32, i32) {
    %c1_i32 = arith.constant 1 : i32
    %0 = arith.muli %arg0, %c1_i32 : i32
    %1 = arith.addi %0, %arg1 : i32
    %c0_i32 = arith.constant 0 : i32
    %c0_i32_0 = arith.constant 0 : i32
    return %c0_i32, %1 : i32, i32
  }
  func.func @transform_2(%arg0: i32, %arg1: i32) -> (i32, i32) {
    %c1_i32 = arith.constant 1 : i32
    %0 = arith.muli %arg0, %c1_i32 : i32
    %1 = arith.addi %0, %arg1 : i32
    %c0_i32 = arith.constant 0 : i32
    %c0_i32_0 = arith.constant 0 : i32
    return %c0_i32, %1 : i32, i32
  }
  func.func @transform_3(%arg0: i32, %arg1: i32) -> (i32, i32, i32) {
    %c0_i32 = arith.constant 0 : i32
    %c0_i32_0 = arith.constant 0 : i32
    %c0_i32_1 = arith.constant 0 : i32
    return %arg0, %c0_i32, %c0_i32_0 : i32, i32, i32
  }
}

</mosaic_0001>

<bundles_post_ra>
// kernel: custom_loss.1
= control target key start
LH: loop header
LB: loop body
LE: loop exit
PB: predicated region body
PF: predicated region fallthrough
CT: control target
= control target key end

     0   :  { %8 = vsyncpa [#allocation5], 0  ;;  %s260_s0 = inlined_call_operand.vmem [shape: f32[6], index: 0, kind: input, shape index: {}]   ;;  %s261_s1 = inlined_call_operand.vmem [shape: f32[3,128], index: 1, kind: input, shape index: {}]   ;;  %s262_s2 = inlined_call_operand.vmem [shape: f32[3,128], index: 2, kind: input, shape index: {}]   ;;  %s263_s3 = inlined_call_operand.hbm [shape: f32[1,1,1], index: 3, kind: output, shape index: {}]  }
   0x1   :  { %9 = vsyncpa [#allocation4], 0  ;;  %s16_s14 = sshll.u32 %s260_s0, 4  ;;  %s17_s14 = int_to_ptr.vmem [resolvable:$true] %s16_s14 }
   0x2   :  { %s178_s15 = scalar_lea.vmem %s17_s14, 16  ;;  %p183_p1 = scmp.lt.s32.totalorder %s17_s14, %s17_s14 }
   0x3   :  { %p179_p0 = scmp.ne.s32.totalorder %s17_s14, %s178_s15  ;;  %p184_p2 = scmp.lt.s32.totalorder %s178_s15, %s178_s15 }
   0x5   :  { %p185_p3 = por %p184_p2, %p183_p1 }
   0x7   :  { %p186_p4 = pnand %p185_p3, %p179_p0 }
   0x9   :  { %189 = shalt.err (!%p186_p4)
}
   0xa   :  { %s216_s16 = smov [#allocation3]  }
   0xb   :  { %19 = dma.vmem_to_smem %s17_s14, 16, %s216_s16, [#allocation5]  }
   0xc   :  { %212 = dma.done.wait [#allocation5], 16  }
   0xd   :  { %213 = vsyncadd [#allocation5], 4294967280 }
   0xe   :  { %39 = sfence }
   0xf   :  { %v67_v0 = vld [vmem:[%s261_s1] sm:$0x7]  ;;  %v217_v2 = vmov 0.0   ;;  %s75_s0 = sld [smem:[#allocation3]]  ;;  %s168_s21 = sld [smem:[#allocation3 + $0x1]]  ;;  %vm127_vm0 = vcmask 1040384  }
  0x10   :  { %v68_v1 = vld [vmem:[%s262_s2] sm:$0x7]  ;;  %66 = vst [vmem:[#allocation2] sm:$0x1] %v217_v2  ;;  %s169_s22 = sld [smem:[#allocation3 + $0x2]]  ;;  %s170_s23 = sld [smem:[#allocation3 + $0x3]] }
  0x11   :  { %v69_v3 = vsub.f32 %v67_v0, %v68_v1  ;;  %s172_s24 = sld [smem:[#allocation3 + $0x5]]  ;;  %s171_s25 = sld [smem:[#allocation3 + $0x4]]  ;;  %vm139_vm1 = vcmask 0  }
  0x12   :  { %s218_s1 = smov [#allocation6]  }
  0x13   :  { %v70_v4 = vadd.f32 3.1415927, %v69_v3  ;;  %v81_v5 = vmul.f32 %v69_v3, %v69_v3  ;;  %v98_v12 = vrot.slane %v69_v3, 1  ;;  %s147_s2 = sshll.u32 %s218_s1, 4  ;;  %s148_s2 = int_to_ptr.vmem [resolvable:$true] %s147_s2 }
  0x14   :  { %s190_s27 = scalar_lea.vmem %s148_s2, 16  ;;  %s194_s28 = scalar_lea.vmem %s148_s2, 32 }
  0x15   :  { %v71_v6 = vmul.f32 0.15915494, %v70_v4  ;;  %v84_v8 = vstv %s168_s21  ;;  %v82_v9 = vstv %s75_s0  ;;  %v100_v18 = vmul.f32 %v98_v12, %v69_v3  ;;  %p191_p5 = scmp.ne.s32.totalorder %s148_s2, %s190_s27  ;;  %p195_p6 = scmp.lt.s32.totalorder %s148_s2, %s148_s2 }
  0x16   :  { %v85_v10 = vmul.f32 %v84_v8, %v81_v5  ;;  %v83_v14 = vmul.f32 %v82_v9, %v81_v5  ;;  %v91_v16 = vstv %s169_s22  ;;  %v101_v21 = vstv %s170_s23  ;;  %p196_p7 = scmp.lt.s32.totalorder %s194_s28, %s190_s27 }
  0x17   :  { %v72_v7 = vfloor.f32 %v71_v6  ;;  %v114_v22 = vstv %s172_s24  ;;  %v108_v27 = vstv %s171_s25  ;;  %v102_v29 = vmul.f32 %v101_v21, %v100_v18  ;;  %v120_v36 = vld [vmem:[#allocation2] sm:$0x1] }
  0x18   :  { %v87_v15 = vrot.slane %v85_v10, 1  ;;  %p197_p8 = por %p196_p7, %p195_p6 }
  0x19   :  { %v73_v11 = vmul.f32 6.2831855, %v72_v7 }
  0x1a   :  { %v89_v23 = vadd.f32 %v87_v15, %v83_v14  ;;  %p198_p9 = pnand %p197_p8, %p191_p5 }
  0x1b   :  { %v74_v13 = vsub.f32 %v69_v3, %v73_v11 }
  0x1d   :  { %v90_v17 = vmul.f32 %v74_v13, %v74_v13  ;;  %v105_v19 = vrot.slane %v74_v13, 2  ;;  %v111_v20 = vrot.slane %v74_v13, 1 }
  0x1f   :  { %v92_v24 = vmul.f32 %v91_v16, %v90_v17  ;;  %v107_v25 = vmul.f32 %v105_v19, %v69_v3  ;;  %v113_v26 = vmul.f32 %v111_v20, %v69_v3 }
  0x21   :  { %v94_v28 = vrot.slane %v92_v24, 2  ;;  %v115_v30 = vmul.f32 %v114_v22, %v113_v26  ;;  %v109_v32 = vmul.f32 %v108_v27, %v107_v25 }
  0x23   :  { %v96_v31 = vadd.f32 %v94_v28, %v89_v23  ;;  %v117_v34 = vrot.slane %v115_v30, 1 }
  0x25   :  { %v103_v33 = vadd.f32 %v102_v29, %v96_v31 }
  0x27   :  { %v110_v35 = vadd.f32 %v109_v32, %v103_v33 }
  0x29   :  { %v119_v37 = vadd.f32 %v117_v34, %v110_v35 }
  0x2b   :  { %v121_v38 = vadd.f32 %v120_v36, %v119_v37 }
  0x2d   :  { %122 = vst [vmem:[#allocation2] sm:$0x1] %v121_v38 }
  0x34   :  { %v126_v39 = vld [vmem:[#allocation2] sm:$0x1] }
  0x35   :  { %v128_v40 = vsel %vm127_vm0, %v126_v39, 0.0 }
  0x36   :  { %129 = vadd.xlane.f32.xlu0 %v128_v40 }
  0xc3   :  { %v130_v41 = vpop.xlane.xlu0 %129 }
  0xc4   :  { %v131_v42 = vrot.slane %v130_v41, 4 }
  0xc6   :  { %v132_v43 = vadd.f32 %v131_v42, %v130_v41 }
  0xc8   :  { %v133_v44 = vrot.slane %v132_v43, 2 }
  0xca   :  { %v134_v45 = vadd.f32 %v133_v44, %v132_v43 }
  0xcc   :  { %v135_v46 = vrot.slane %v134_v45, 1 }
  0xce   :  { %v136_v47 = vadd.f32 %v135_v46, %v134_v45 }
  0xd0   :  { %173 = vpush %v136_v47 }
 0x101   :  { %s174_s26 = spop %173 }
 0x102   :  { %v138_v48 = vstv %s174_s26 }
 0x103   :  { %140 = vst.msk [vmem:[#allocation6] sm:$0x1] %vm139_vm1, %v138_v48 }
 0x104   :  { %201 = shalt.err (!%p198_p9)
}
 0x105   :  { %s202_s4 = scalar_lea.hbm %s263_s3, 16 }
 0x106   :  { %p203_p10 = scmp.ne.s32.totalorder %s263_s3, %s202_s4  ;;  %p206_p11 = scmp.lt.u32.totalorder %s202_s4, %s263_s3 }
 0x108   :  { %p208_p12 = pnand %p206_p11, %p203_p10 }
 0x10a   :  { %211 = shalt.err (!%p208_p12)
}
 0x10b   :  { %150 = dma.vmem_to_hbm [thread:$0]  %s148_s2, 16, %s263_s3, [#allocation4]  }
 0x10c   :  { %214 = dma.done.wait [#allocation4], 16  }
 0x10d   :  { %215 = vsyncadd [#allocation4], 4294967280 }
 0x10e   :  { %154 = vsyncpa [#allocation4], 1 }
 0x10f   :  { %155 = vsyncpa [#allocation5], 1 }

</bundles_post_ra>
